<compile_context>
chip_gen: v7x
topology: tpu7x:2x2x1
jax: 0.10.0
libtpu: 0.0.40
codegen_flags: <defaults>
</compile_context>

<pallas_src>
import functools

import jax
import jax.numpy as jnp
from jax import lax
from jax.experimental import pallas as pl
from jax.experimental.pallas import tpu as pltpu


def _round_up(v, m):
    return ((v + m - 1) // m) * m


def _cdiv(a, b):
    return -(-a // b)


def _epilogue(acc_f32, b_ref, res_ref, with_act, add_residual, out_dtype):
    out = acc_f32 + b_ref[...].astype(jnp.float32)
    if with_act:
        out = jnp.maximum(out, 0.0)
    if add_residual:
        # Matches the PyTorch module: residual is added AFTER activation.
        out = out + res_ref[...].astype(jnp.float32)
    return out.astype(out_dtype)


def _fc_kernel_single_k(*refs, with_act, add_residual):
    # Whole contraction in one block: no accumulator scratch, no pl.when.
    if add_residual:
        x_ref, w_ref, b_ref, res_ref, o_ref = refs
    else:
        x_ref, w_ref, b_ref, o_ref = refs
        res_ref = None
    acc = lax.dot_general(
        x_ref[...],
        w_ref[...],
        dimension_numbers=(((1,), (1,)), ((), ())),
        preferred_element_type=jnp.float32,
    )
    o_ref[...] = _epilogue(acc, b_ref, res_ref, with_act, add_residual, o_ref.dtype)


def _fc_kernel_multi_k(*refs, with_act, add_residual, k_rem, tk):
    if add_residual:
        x_ref, w_ref, b_ref, res_ref, o_ref, acc_ref = refs
    else:
        x_ref, w_ref, b_ref, o_ref, acc_ref = refs
        res_ref = None

    kk = pl.program_id(2)
    nk = pl.num_programs(2)

    @pl.when(kk == 0)
    def _():
        acc_ref[...] = jnp.zeros_like(acc_ref)

    x = x_ref[...]
    w = w_ref[...]
    if k_rem:
        # The last K block overhangs the logical K extent and x / W are NOT
        # padded in HBM, so the overhang holds garbage -> zero it on both
        # operands (0 * garbage on only one side could still produce NaN).
        k_valid = jnp.where(kk == nk - 1, k_rem, tk)
        xcol = lax.broadcasted_iota(jnp.int32, x.shape, 1)
        wcol = lax.broadcasted_iota(jnp.int32, w.shape, 1)
        x = jnp.where(xcol < k_valid, x, jnp.zeros_like(x))
        w = jnp.where(wcol < k_valid, w, jnp.zeros_like(w))

    acc_ref[...] += lax.dot_general(
        x,
        w,
        dimension_numbers=(((1,), (1,)), ((), ())),
        preferred_element_type=jnp.float32,
    )

    @pl.when(kk == nk - 1)
    def _():
        o_ref[...] = _epilogue(
            acc_ref[...], b_ref, res_ref, with_act, add_residual, o_ref.dtype
        )


def fc_forward(
    x,
    weight,
    bias,
    *,
    with_act=True,
    add_residual=False,
    residual=None,
    compute_dtype=jnp.bfloat16,
    tm=None,
    tn=None,
    tk=None,
    min_pallas_flops=1 << 22,
    force_pallas=False,
):
    """FC forward.

    x:      (N, in_features)
    weight: (out_features, in_features)   -- PyTorch nn.Linear layout
    bias:   (out_features,)
    Returns (N, out_features) in x.dtype.
    """
    n, k = x.shape
    out_f, k2 = weight.shape
    assert k == k2, "weight in_features mismatch"

    if add_residual and residual is None:
        assert out_f == k, "residual=None requires out_features == in_features"
        residual = x
    if add_residual:
        assert residual.shape == (n, out_f)

    # ---- tiny-shape fast path: launch/tiling overhead dominates; XLA wins ----
    flops = 2 * n * k * out_f
    if not force_pallas and flops < min_pallas_flops:
        if compute_dtype is not None:
            xm, wm = x.astype(compute_dtype), weight.astype(compute_dtype)
            prec = lax.Precision.DEFAULT
        else:
            xm, wm = x, weight
            prec = lax.Precision.HIGHEST
        out = lax.dot_general(
            xm, wm, (((1,), (1,)), ((), ())),
            precision=prec, preferred_element_type=jnp.float32,
        ) + bias.astype(jnp.float32)
        if with_act:
            out = jnp.maximum(out, 0.0)
        if add_residual:
            out = out + residual.astype(jnp.float32)
        return out.astype(x.dtype)

    # ---- operand cast (bf16 MXU feed; accumulation stays f32 in-kernel) ----
    if compute_dtype is not None and x.dtype != compute_dtype:
        x_c = x.astype(compute_dtype)
    else:
        x_c = x
    if compute_dtype is not None and weight.dtype != compute_dtype:
        w_c = weight.astype(compute_dtype)
    else:
        w_c = weight
    itemsize = jnp.dtype(x_c.dtype).itemsize

    # Sublane packing: f32 -> 8 rows, bf16 -> 16, int8/fp8 -> 32.
    sub = max(8, 32 // max(itemsize, 1))

    # ---- tile selection (double-buffered working set <= ~8 MiB: fits every
    #      generation's scoped-VMEM default, incl. v7x's 32 MiB / 64 MiB) ----
    if tm is None:
        tm_cap = 512 if itemsize <= 2 else 256
        tm = min(_round_up(n, sub), tm_cap)
    else:
        tm = _round_up(tm, sub)
    gi = _cdiv(n, tm)

    if tn is None:
        tn = min(_round_up(out_f, 128), 256)
        # v7x has 2 TensorCores: if the i axis has a single block, make sure
        # the j axis has >= 2 parallel blocks.
        if gi == 1 and out_f > 128 and _cdiv(out_f, tn) == 1:
            tn = 128
    else:
        tn = _round_up(tn, 128)
    gj = _cdiv(out_f, tn)

    if tk is None:
        tk_single_cap = 2048 if itemsize <= 2 else 1024
        if k <= tk_single_cap:
            tk = k                                   # one full-extent K block
        else:
            tk = 1024 if itemsize <= 2 else 512      # tiled K
    single_k = tk >= k
    if single_k:
        tk = k

    b2d = bias.reshape(1, out_f)
    inputs = [x_c, w_c, b2d]

    out_itemsize = jnp.dtype(x.dtype).itemsize
    cost = pl.CostEstimate(
        flops=2 * n * k * out_f,
        transcendentals=0,
        bytes_accessed=(
            gj * n * k * itemsize            # x re-read once per j block
            + gi * out_f * k * itemsize      # W re-streamed once per i block
            + out_f * jnp.dtype(bias.dtype).itemsize
            + n * out_f * out_itemsize
            + (n * out_f * jnp.dtype(residual.dtype).itemsize if add_residual else 0)
        ),
    )

    if single_k:
        grid = (gi, gj)
        in_specs = [
            pl.BlockSpec((tm, k), lambda i, j: (i, 0)),    # x       (N, K)
            pl.BlockSpec((tn, k), lambda i, j: (j, 0)),    # weight  (out_f, K)
            pl.BlockSpec((1, tn), lambda i, j: (0, j)),    # bias
        ]
        if add_residual:
            inputs.append(residual)
            in_specs.append(pl.BlockSpec((tm, tn), lambda i, j: (i, j)))
        out_spec = pl.BlockSpec((tm, tn), lambda i, j: (i, j))
        scratch = []
        kernel = functools.partial(
            _fc_kernel_single_k, with_act=with_act, add_residual=add_residual
        )
        dim_sem = ("parallel", "parallel")
    else:
        gk = _cdiv(k, tk)
        k_rem = k % tk
        grid = (gi, gj, gk)
        in_specs = [
            pl.BlockSpec((tm, tk), lambda i, j, kk: (i, kk)),   # x
            pl.BlockSpec((tn, tk), lambda i, j, kk: (j, kk)),   # weight
            pl.BlockSpec((1, tn), lambda i, j, kk: (0, j)),     # bias
        ]
        if add_residual:
            inputs.append(residual)
            in_specs.append(pl.BlockSpec((tm, tn), lambda i, j, kk: (i, j)))
        out_spec = pl.BlockSpec((tm, tn), lambda i, j, kk: (i, j))
        scratch = [pltpu.VMEM((tm, tn), jnp.float32)]
        kernel = functools.partial(
            _fc_kernel_multi_k,
            with_act=with_act,
            add_residual=add_residual,
            k_rem=k_rem,
            tk=tk,
        )
        dim_sem = ("parallel", "parallel", "arbitrary")

    out = pl.pallas_call(
        kernel,
        out_shape=jax.ShapeDtypeStruct((n, out_f), x.dtype),
        grid_spec=pltpu.PrefetchScalarGridSpec(
            num_scalar_prefetch=0,
            grid=grid,
            in_specs=in_specs,
            out_specs=out_spec,
            scratch_shapes=scratch,
        ),
        compiler_params=pltpu.CompilerParams(dimension_semantics=dim_sem),
        cost_estimate=cost,
    )(*inputs)
    return out
    # TODO(synk): with_bn=True (BatchNorm1d) path not implemented; module default is with_bn=False.


if __name__ == "__main__":
    key = jax.random.PRNGKey(0)
    kx, kw, kb, kx2, kw2, kb2, kx3, kw3, kb3 = jax.random.split(key, 9)

    def ref_fc(x, w, b, *, with_act, residual=None, cast=None):
        if cast is not None:
            x = x.astype(cast).astype(jnp.float32)
            w = w.astype(cast).astype(jnp.float32)
        out = jnp.dot(x, w.T, precision=lax.Precision.HIGHEST) + b
        if with_act:
            out = jnp.maximum(out, 0.0)
        if residual is not None:
            out = out + residual
        return out

    # ---- FC(32, 32) defaults at tiny shapes (forced through Pallas) ----
    N, IN_C, OUT_C = 8, 32, 32
    x = jax.random.normal(kx, (N, IN_C), dtype=jnp.float32)
    w = jax.random.normal(kw, (OUT_C, IN_C), dtype=jnp.float32) * 0.1
    b = jax.random.normal(kb, (OUT_C,), dtype=jnp.float32) * 0.1

    # f32 compute path: Linear -> ReLU
    out = fc_forward(x, w, b, with_act=True, compute_dtype=None, force_pallas=True)
    out = jax.block_until_ready(out)
    assert out.shape == (N, OUT_C)
    assert jnp.allclose(out, ref_fc(x, w, b, with_act=True), atol=1e-5, rtol=1e-5)

    # no-activation, f32
    out_lin = fc_forward(x, w, b, with_act=False, compute_dtype=None, force_pallas=True)
    out_lin = jax.block_until_ready(out_lin)
    assert jnp.allclose(out_lin, ref_fc(x, w, b, with_act=False), atol=1e-5, rtol=1e-5)

    # add_residual (residual=None -> residual = x, added after activation), bf16 feed
    out_res = fc_forward(x, w, b, with_act=True, add_residual=True, force_pallas=True)
    out_res = jax.block_until_ready(out_res)
    ref_res = ref_fc(x, w, b, with_act=True, residual=x, cast=jnp.bfloat16)
    assert jnp.allclose(out_res, ref_res, atol=2e-3, rtol=2e-3)

    # tiny-shape XLA fallback path (default, not forced)
    out_fb = fc_forward(x, w, b, with_act=True, compute_dtype=None)
    out_fb = jax.block_until_ready(out_fb)
    assert jnp.allclose(out_fb, ref_fc(x, w, b, with_act=True), atol=1e-5, rtol=1e-5)

    # ---- medium shape: default bf16 Pallas path, single-K block ----
    N2, IN2, OUT2 = 256, 512, 256
    x2 = jax.random.normal(kx2, (N2, IN2), dtype=jnp.float32)
    w2 = jax.random.normal(kw2, (OUT2, IN2), dtype=jnp.float32) * 0.05
    b2 = jax.random.normal(kb2, (OUT2,), dtype=jnp.float32) * 0.1
    out2 = fc_forward(x2, w2, b2, with_act=True)
    out2 = jax.block_until_ready(out2)
    ref2 = ref_fc(x2, w2, b2, with_act=True, cast=jnp.bfloat16)
    assert jnp.allclose(out2, ref2, atol=5e-3, rtol=5e-3)

    # ---- tiled-K path with a ragged K tail (exercises in-kernel masking) ----
    N3, IN3, OUT3 = 64, 2100, 128
    x3 = jax.random.normal(kx3, (N3, IN3), dtype=jnp.float32)
    w3 = jax.random.normal(kw3, (OUT3, IN3), dtype=jnp.float32) * 0.02
    b3 = jax.random.normal(kb3, (OUT3,), dtype=jnp.float32) * 0.1
    out3 = fc_forward(x3, w3, b3, with_act=True)
    out3 = jax.block_until_ready(out3)
    ref3 = ref_fc(x3, w3, b3, with_act=True, cast=jnp.bfloat16)
    assert jnp.allclose(out3, ref3, atol=5e-3, rtol=5e-3)

    print("KERNEL_OK")
</pallas_src>

<mosaic_0001>
module attributes {stable_mosaic.version = 11 : i64} {
  func.func @_fc_kernel_single_k(%arg0: i32, %arg1: i32, %arg2: memref<8x32xf32, #tpu.memory_space<vmem>>, %arg3: memref<128x32xf32, #tpu.memory_space<vmem>>, %arg4: memref<1x128xf32, #tpu.memory_space<vmem>>, %arg5: memref<8x128xf32, #tpu.memory_space<vmem>>) attributes {dimension_semantics = [#tpu.dimension_semantics<parallel>, #tpu.dimension_semantics<parallel>], iteration_bounds = array<i64: 1, 1>, scalar_prefetch = 0 : i64, scratch_operands = 0 : i64, tpu.core_type = #tpu.core_type<tc>, window_params = [{transform_indices = @transform_0, window_bounds = array<i64: 8, 32>}, {transform_indices = @transform_1, window_bounds = array<i64: 128, 32>}, {transform_indices = @transform_2, window_bounds = array<i64: 1, 128>}, {transform_indices = @transform_3, window_bounds = array<i64: 8, 128>}]} {
    %c0 = arith.constant 0 : index
    %c0_0 = arith.constant 0 : index
    %0 = vector.load %arg2[%c0, %c0_0] : memref<8x32xf32, #tpu.memory_space<vmem>>, vector<8x32xf32>
    %c0_1 = arith.constant 0 : index
    %c0_2 = arith.constant 0 : index
    %1 = vector.load %arg3[%c0_1, %c0_2] : memref<128x32xf32, #tpu.memory_space<vmem>>, vector<128x32xf32>
    %cst = arith.constant dense<0.000000e+00> : vector<8x128xf32>
    %2 = tpu.matmul %0, %1, %cst {dimension_numbers = #tpu.dot_dimension_numbers<[1], [1], [0], [0], [0, 0, 1, 0], [], []>} : vector<8x32xf32>, vector<128x32xf32>, vector<8x128xf32> -> vector<8x128xf32>
    %c0_3 = arith.constant 0 : index
    %c0_4 = arith.constant 0 : index
    %3 = vector.load %arg4[%c0_3, %c0_4] : memref<1x128xf32, #tpu.memory_space<vmem>>, vector<1x128xf32>
    %4 = vector.broadcast %3 : vector<1x128xf32> to vector<8x128xf32>
    %5 = arith.addf %2, %4 : vector<8x128xf32>
    %cst_5 = arith.constant 0.000000e+00 : f32
    %6 = vector.broadcast %cst_5 : f32 to vector<8x128xf32>
    %7 = arith.maximumf %5, %6 : vector<8x128xf32>
    %c0_6 = arith.constant 0 : index
    %c0_7 = arith.constant 0 : index
    %8 = vector.load %arg5[%c0_6, %c0_7] : memref<8x128xf32, #tpu.memory_space<vmem>>, vector<8x128xf32>
    tpu.vector_store %arg5[%c0_6, %c0_7], %7 {strides = array<i32>} : memref<8x128xf32, #tpu.memory_space<vmem>>, vector<8x128xf32>,
    return
  }
  func.func @transform_0(%arg0: i32, %arg1: i32) -> (i32, i32) {
    %c0_i32 = arith.constant 0 : i32
    %c0_i32_0 = arith.constant 0 : i32
    return %arg0, %c0_i32 : i32, i32
  }
  func.func @transform_1(%arg0: i32, %arg1: i32) -> (i32, i32) {
    %c0_i32 = arith.constant 0 : i32
    %c0_i32_0 = arith.constant 0 : i32
    return %arg1, %c0_i32 : i32, i32
  }
  func.func @transform_2(%arg0: i32, %arg1: i32) -> (i32, i32) {
    %c0_i32 = arith.constant 0 : i32
    %c0_i32_0 = arith.constant 0 : i32
    return %c0_i32, %arg1 : i32, i32
  }
  func.func @transform_3(%arg0: i32, %arg1: i32) -> (i32, i32) {
    %c0_i32 = arith.constant 0 : i32
    return %arg0, %arg1 : i32, i32
  }
}

</mosaic_0001>

<bundles_post_ra>
// kernel: tpu_custom_call.1
= control target key start
LH: loop header
LB: loop body
LE: loop exit
PB: predicated region body
PF: predicated region fallthrough
CT: control target
= control target key end

     0   :  { %8 = vsyncpa [#allocation3], 0  ;;  %s477_s0 = inlined_call_operand.hbm [shape: f32[8,32], index: 0, kind: input, shape index: {}]   ;;  %s478_s1 = inlined_call_operand.hbm [shape: f32[32,32], index: 1, kind: input, shape index: {}]   ;;  %s479_s2 = inlined_call_operand.vmem [shape: f32[1,32], index: 2, kind: input, shape index: {}]   ;;  %s480_s3 = inlined_call_operand.hbm [shape: f32[8,32], index: 3, kind: output, shape index: {}]  }
   0x1   :  { %9 = vsyncpa [#allocation6], 0 }
   0x2   :  { %10 = vsyncpa [#allocation4], 0  ;;  %s387_s12 = smov [#allocation2]   ;;  %s315_s16 = scalar_lea.hbm %s477_s0, 128 }
   0x3   :  { %s17_s13 = sshll.u32 %s387_s12, 4  ;;  %p316_p0 = scmp.ne.s32.totalorder %s477_s0, %s315_s16  ;;  %s18_s13 = int_to_ptr.vmem [resolvable:$true] %s17_s13 }
   0x4   :  { %p319_p1 = scmp.lt.u32.totalorder %s315_s16, %s477_s0 }
   0x6   :  { %p321_p2 = pnand %p319_p1, %p316_p0 }
   0x8   :  { %324 = shalt.err (!%p321_p2)
}
   0x9   :  { %s325_s21 = scalar_lea.vmem %s18_s13, 128  ;;  %p330_p4 = scmp.lt.s32.totalorder %s18_s13, %s18_s13 }
   0xa   :  { %p326_p3 = scmp.ne.s32.totalorder %s18_s13, %s325_s21  ;;  %p331_p5 = scmp.lt.s32.totalorder %s325_s21, %s325_s21 }
   0xc   :  { %p332_p6 = por %p331_p5, %p330_p4 }
   0xe   :  { %p333_p7 = pnand %p332_p6, %p326_p3 }
  0x10   :  { %336 = shalt.err (!%p333_p7)
}
  0x11   :  { %20 = dma.hbm_to_vmem [thread:$0]  %s477_s0, 128, %s18_s13, [#allocation3]  }
  0x12   :  { %25 = vsyncadd [#allocation6], 1536  ;;  %s388_s24 = smov [#allocation5]   ;;  %s337_s28 = scalar_lea.hbm %s478_s1, 512 }
  0x13   :  { %s26_s25 = sshll.u32 %s388_s24, 4  ;;  %p338_p8 = scmp.ne.s32.totalorder %s478_s1, %s337_s28  ;;  %s27_s25 = int_to_ptr.vmem [resolvable:$true] %s26_s25 }
  0x14   :  { %p341_p9 = scmp.lt.u32.totalorder %s337_s28, %s478_s1 }
  0x16   :  { %p343_p10 = pnand %p341_p9, %p338_p8 }
  0x18   :  { %346 = shalt.err (!%p343_p10)
}
  0x19   :  { %s347_s6 = scalar_lea.vmem %s27_s25, 512  ;;  %s351_s0 = scalar_lea.vmem %s27_s25, 2048 }
  0x1a   :  { %p348_p11 = scmp.ne.s32.totalorder %s27_s25, %s347_s6  ;;  %p352_p12 = scmp.lt.s32.totalorder %s27_s25, %s27_s25 }
  0x1b   :  { %p353_p13 = scmp.lt.s32.totalorder %s351_s0, %s347_s6 }
  0x1d   :  { %p354_p0 = por %p353_p13, %p352_p12 }
  0x1f   :  { %p355_p1 = pnand %p354_p0, %p348_p11 }
  0x21   :  { %358 = shalt.err (!%p355_p1)
}
  0x22   :  { %s389_s7 = smov 128   ;;  %s390_s8 = smov 8  }
  0x23   :  { %32 = dma.hbm_to_vmem [thread:$0]  %s478_s1, 512, %s27_s25, [#allocation6], %s389_s7, %s389_s7, %s390_s8  }
  0x24   :  { %381 = dma.done.wait [#allocation3], 128  }
  0x25   :  { %382 = vsyncadd [#allocation3], 4294967168 }
  0x26   :  { %383 = dma.done.wait [#allocation6], 2048  }
  0x27   :  { %384 = vsyncadd [#allocation6], 4294965248  ;;  %v391_v0 = vmov 0.0|0.0   ;;  %vm392_vm0 = vmmov 0   ;;  %v393_v1 = vmov 0.0   ;;  %vm65_vm1 = vcmask 261120  }
  0x28   :  { %275 = vmatprep.subr.bf16.mxu0 %v391_v0  ;;  %272 = vmatprep.mubr.msk.f32.mxu0 %vm392_vm0, %v393_v1  ;;  %v42_v2 = vld [vmem:[#allocation5] sm:$0xff]  ;;  %v43_v3 = vld [vmem:[#allocation5 + $0x8] sm:$0xff]  ;;  %vm441_vm2 = vmpackc.low %vm65_vm1, %vm65_vm1  ;;  %s394_s12 = smov [#allocation7]  }
  0x29   :  { %v276_v5 = vpack.c.bf16 %v43_v3, %v42_v2  ;;  %v44_v6 = vld [vmem:[#allocation5 + $0x10] sm:$0xff]  ;;  %v45_v7 = vld [vmem:[#allocation5 + $0x18] sm:$0xff]  ;;  %v46_v9 = vld [vmem:[#allocation5 + $0x20] sm:$0xff]  ;;  %s195_s13 = sshll.u32 %s394_s12, 4  ;;  %s196_s13 = int_to_ptr.vmem [resolvable:$true] %s195_s13 }
  0x2a   :  { %v280_v8 = vpack.c.bf16 %v45_v7, %v44_v6  ;;  %v47_v10 = vld [vmem:[#allocation5 + $0x28] sm:$0xff]  ;;  %v48_v12 = vld [vmem:[#allocation5 + $0x30] sm:$0xff]  ;;  %v49_v13 = vld [vmem:[#allocation5 + $0x38] sm:$0xff]  ;;  %s359_s14 = scalar_lea.vmem %s196_s13, 128  ;;  %p364_p3 = scmp.lt.s32.totalorder %s196_s13, %s196_s13 }
  0x2b   :  { %278 = vmatpush3.bf16.xpose.msk.msra.mxu0 %vm441_vm2, %v276_v5  ;;  %v284_v11 = vpack.c.bf16 %v47_v10, %v46_v9  ;;  %v288_v14 = vpack.c.bf16 %v49_v13, %v48_v12  ;;  %v50_v15 = vld [vmem:[#allocation5 + $0x40] sm:$0xff]  ;;  %v51_v16 = vld [vmem:[#allocation5 + $0x48] sm:$0xff]  ;;  %v52_v18 = vld [vmem:[#allocation5 + $0x50] sm:$0xff]  ;;  %p360_p2 = scmp.ne.s32.totalorder %s196_s13, %s359_s14  ;;  %p365_p4 = scmp.lt.s32.totalorder %s359_s14, %s359_s14 }
  0x2c   :  { %279 = vmatprep.subr.bf16.mxu0 %v391_v0  ;;  %v292_v17 = vpack.c.bf16 %v51_v16, %v50_v15  ;;  %v53_v19 = vld [vmem:[#allocation5 + $0x58] sm:$0xff]  ;;  %v54_v21 = vld [vmem:[#allocation5 + $0x60] sm:$0xff]  ;;  %v55_v22 = vld [vmem:[#allocation5 + $0x68] sm:$0xff] }
  0x2d   :  { %v296_v20 = vpack.c.bf16 %v53_v19, %v52_v18  ;;  %v300_v23 = vpack.c.bf16 %v55_v22, %v54_v21  ;;  %v56_v24 = vld [vmem:[#allocation5 + $0x70] sm:$0xff]  ;;  %v57_v25 = vld [vmem:[#allocation5 + $0x78] sm:$0xff]  ;;  %p366_p5 = por %p365_p4, %p364_p3 }
  0x2e   :  { %v304_v26 = vpack.c.bf16 %v57_v25, %v56_v24  ;;  %v41_v27 = vld [vmem:[#allocation2] sm:$0xff] }
  0x2f   :  { %v205_v28 = vld [vmem:[%s479_s2] ss:$0 sm:$0xff]  ;;  %p367_p6 = pnand %p366_p5, %p360_p2 }
  0x33   :  { %282 = vmatpush3.bf16.xpose.msk.msra.mxu0 %vm441_vm2, %v280_v8 }
  0x34   :  { %283 = vmatprep.subr.bf16.mxu0 %v391_v0 }
  0x3b   :  { %286 = vmatpush3.bf16.xpose.msk.msra.mxu0 %vm441_vm2, %v284_v11 }
  0x3c   :  { %287 = vmatprep.subr.bf16.mxu0 %v391_v0 }
  0x43   :  { %290 = vmatpush3.bf16.xpose.msk.msra.mxu0 %vm441_vm2, %v288_v14 }
  0x44   :  { %291 = vmatprep.subr.bf16.mxu0 %v391_v0 }
  0x4b   :  { %294 = vmatpush3.bf16.xpose.msk.msra.mxu0 %vm441_vm2, %v292_v17 }
  0x4c   :  { %295 = vmatprep.subr.bf16.mxu0 %v391_v0 }
  0x53   :  { %298 = vmatpush3.bf16.xpose.msk.msra.mxu0 %vm441_vm2, %v296_v20 }
  0x54   :  { %299 = vmatprep.subr.bf16.mxu0 %v391_v0 }
  0x5b   :  { %302 = vmatpush3.bf16.xpose.msk.msra.mxu0 %vm441_vm2, %v300_v23 }
  0x5c   :  { %303 = vmatprep.subr.bf16.mxu0 %v391_v0 }
  0x63   :  { %306 = vmatpush3.bf16.xpose.msk.msra.mxu0 %vm441_vm2, %v304_v26 }
  0x6a   :  { %273 = vmatmul.mubr.msk.f32.vlgmr.msra.gmra.mrb[0].mxu0 %vm65_vm1, %v41_v27 }
 0x13d   :  { %v183_v29 = vpop.f32.mrb[0].mxu0 }
 0x13e   :  { %v184_v30 = vadd.f32 %v205_v28, %v183_v29  ;;  %v274_v31 = vpop.f32.mrb[1].mxu0 }
 0x140   :  { %v187_v32 = vmax.f32 %v184_v30, 0.0 }
 0x142   :  { %188 = vst [vmem:[#allocation7] sm:$0xff] %v187_v32 }
 0x143   :  { %370 = shalt.err (!%p367_p6)
}
 0x144   :  { %s371_s17 = scalar_lea.hbm %s480_s3, 128 }
 0x145   :  { %p372_p7 = scmp.ne.s32.totalorder %s480_s3, %s371_s17  ;;  %p375_p8 = scmp.lt.u32.totalorder %s371_s17, %s480_s3 }
 0x147   :  { %p377_p9 = pnand %p375_p8, %p372_p7 }
 0x149   :  { %380 = shalt.err (!%p377_p9)
}
 0x14a   :  { %198 = dma.vmem_to_hbm [thread:$0]  %s196_s13, 128, %s480_s3, [#allocation4]  }
 0x14b   :  { %385 = dma.done.wait [#allocation4], 128  }
 0x14c   :  { %386 = vsyncadd [#allocation4], 4294967168 }
 0x14d   :  { %202 = vsyncpa [#allocation3], 1 }
 0x14e   :  { %203 = vsyncpa [#allocation6], 1 }
 0x14f   :  { %204 = vsyncpa [#allocation4], 1 }

</bundles_post_ra>
